<compile_context>
chip_gen: v6e
topology: v6e:2x2x1
jax: 0.10.0
libtpu: 0.0.40
codegen_flags: <defaults>
</compile_context>

<pallas_src>
import jax
import jax.numpy as jnp
from jax.experimental import pallas as pl
from jax.experimental.pallas import tpu as pltpu

EPS = 1e-5
_INV_SQRT2 = 0.7071067811865476


def _round_up(x, m):
    return (x + m - 1) // m * m


def _pad_last(a, target):
    pad = target - a.shape[-1]
    if pad == 0:
        return a
    return jnp.pad(a, [(0, 0)] * (a.ndim - 1) + [(0, pad)])


def _bn_gelu(h, g, be):
    """BatchNorm1d (batch statistics, biased var) folded to per-column affine + exact GELU."""
    inv_n = jnp.float32(1.0 / h.shape[0])
    mean = jnp.sum(h, axis=0, keepdims=True) * inv_n
    c = h - mean
    var = jnp.sum(c * c, axis=0, keepdims=True) * inv_n   # stable: centered, not E[h^2]-E[h]^2
    scale = g * jax.lax.rsqrt(var + EPS)                   # (1, F) per-column affine
    hn = c * scale + be
    return 0.5 * hn * (1.0 + jax.lax.erf(hn * _INV_SQRT2))


def _fused_mlp_kernel(x_ref, w1_ref, b1_ref, g1_ref, be1_ref,
                      w2_ref, b2_ref, g2_ref, be2_ref, o_ref):
    # ---- layer 1: Linear -> BN(batch stats) -> GELU (full batch, full hidden) ----
    h = jnp.dot(x_ref[...], w1_ref[...], preferred_element_type=jnp.float32) + b1_ref[...]
    h = _bn_gelu(h, g1_ref[...], be1_ref[...])
    # ---- layer 2: hidden stays on-chip as bf16, feature tile of W2 ----
    z = jnp.dot(h.astype(jnp.bfloat16), w2_ref[...],
                preferred_element_type=jnp.float32) + b2_ref[...]
    o_ref[...] = _bn_gelu(z, g2_ref[...], be2_ref[...]).astype(o_ref.dtype)


def prepare_params(params, in_dim, hidden, out_dim):
    """One-time pad + cast of all weights / BN params (hoisted out of the forward)."""
    Kp = _round_up(in_dim, 128)
    Hp = _round_up(hidden, 128)
    Fp = _round_up(out_dim, 128)
    prep = {
        "in_dim": in_dim, "hidden": hidden, "out_dim": out_dim,
        "Kp": Kp, "Hp": Hp, "Fp": Fp,
        "w1": jnp.pad(params["w1"], ((0, Kp - in_dim), (0, Hp - hidden))).astype(jnp.bfloat16),
        "b1": _pad_last(params["b1"].reshape(1, -1).astype(jnp.float32), Hp),
        "g1": _pad_last(params["g1"].reshape(1, -1).astype(jnp.float32), Hp),
        "be1": _pad_last(params["be1"].reshape(1, -1).astype(jnp.float32), Hp),
        "w2": jnp.pad(params["w2"], ((0, Hp - hidden), (0, Fp - out_dim))).astype(jnp.bfloat16),
        "b2": _pad_last(params["b2"].reshape(1, -1).astype(jnp.float32), Fp),
        "g2": _pad_last(params["g2"].reshape(1, -1).astype(jnp.float32), Fp),
        "be2": _pad_last(params["be2"].reshape(1, -1).astype(jnp.float32), Fp),
    }
    return prep


def inference_mlp_forward(x, prep, *, tile_out=512):
    """y = GELU(BN(GELU(BN(x@w1+b1))@w2+b2)) with batch statistics, one pallas_call."""
    N, K = x.shape
    assert K == prep["in_dim"]
    Kp, Hp, F = prep["Kp"], prep["Hp"], prep["out_dim"]

    # Tile layer-2 output features. Keep >= 2 tiles when F >= 256 so both v7x
    # TensorCores get work; a single 128-wide tile for tiny F (nothing to split).
    Fp = _round_up(F, 128)
    tn = min(_round_up(tile_out, 128), Fp)
    if tn == Fp and Fp >= 256:
        tn = _round_up(Fp // 2, 128)
    Fp = _round_up(Fp, tn)
    grid_n = Fp // tn
    w2_bufs = 3 if grid_n >= 3 else 2

    # Pad w2/BN2 columns if the tile rounding grew Fp beyond the prepared padding.
    w2 = _pad_last(prep["w2"], Fp)
    b2 = _pad_last(prep["b2"], Fp)
    g2 = _pad_last(prep["g2"], Fp)
    be2 = _pad_last(prep["be2"], Fp)

    # VMEM budget (double-buffered pipelined blocks + hidden activation slack).
    vmem_est = (2 * N * Kp * 2                 # x  (bf16)
                + 2 * Kp * Hp * 2              # w1 (bf16, block index constant)
                + 2 * 3 * Hp * 4               # BN1 params
                + w2_bufs * Hp * tn * 2        # w2 (bf16), streamed per tile
                + 2 * 3 * tn * 4               # BN2 params
                + 2 * N * tn * 4               # output (f32)
                + 2 * N * Hp * 4)              # hidden activation intermediates
    assert vmem_est <= (28 << 20), (
        f"fused inference_mlp blocks need ~{vmem_est >> 20} MiB VMEM; reduce batch/"
        "tile_out or fall back to a two-pass (per-layer, K-tiled) implementation.")
    vmem_bytes = int(min(max(2 * vmem_est, 4 << 20), 32 << 20))

    cost = pl.CostEstimate(
        flops=2 * N * Kp * Hp * grid_n + 2 * N * Hp * Fp,
        transcendentals=N * Hp * grid_n + N * Fp,
        bytes_accessed=(N * Kp * 2) + (Kp * Hp * 2) + (Hp * Fp * 2)
                       + 3 * (Hp + Fp) * 4 + (N * Fp * 4),
    )

    xp = _pad_last(x, Kp).astype(jnp.bfloat16)

    w2_kwargs = {}
    if grid_n >= 3:
        w2_kwargs["pipeline_mode"] = pl.Buffered(3)

    out = pl.pallas_call(
        _fused_mlp_kernel,
        out_shape=jax.ShapeDtypeStruct((N, Fp), jnp.float32),
        grid=(grid_n,),
        in_specs=[
            pl.BlockSpec((N, Kp), lambda j: (0, 0)),        # x: full batch (BN needs all rows)
            pl.BlockSpec((Kp, Hp), lambda j: (0, 0)),       # w1: whole, stays VMEM-resident
            pl.BlockSpec((1, Hp), lambda j: (0, 0)),        # b1
            pl.BlockSpec((1, Hp), lambda j: (0, 0)),        # g1
            pl.BlockSpec((1, Hp), lambda j: (0, 0)),        # be1
            pl.BlockSpec((Hp, tn), lambda j: (0, j), **w2_kwargs),  # w2 feature tile
            pl.BlockSpec((1, tn), lambda j: (0, j)),        # b2
            pl.BlockSpec((1, tn), lambda j: (0, j)),        # g2
            pl.BlockSpec((1, tn), lambda j: (0, j)),        # be2
        ],
        out_specs=pl.BlockSpec((N, tn), lambda j: (0, j)),
        compiler_params=pltpu.CompilerParams(
            dimension_semantics=("parallel",),
            vmem_limit_bytes=vmem_bytes,
        ),
        cost_estimate=cost,
    )(xp, prep["w1"], prep["b1"], prep["g1"], prep["be1"], w2, b2, g2, be2)

    return out[:, :F]


def init_params(key, in_dim, hidden, out_dim):
    k1, k2, k3, k4 = jax.random.split(key, 4)
    s1 = 1.0 / jnp.sqrt(in_dim)
    s2 = 1.0 / jnp.sqrt(hidden)
    return {
        "w1": jax.random.uniform(k1, (in_dim, hidden), jnp.float32, -s1, s1),
        "b1": jax.random.uniform(k2, (hidden,), jnp.float32, -s1, s1),
        "g1": jnp.ones((hidden,), jnp.float32),    # BatchNorm1d weight
        "be1": jnp.zeros((hidden,), jnp.float32),  # BatchNorm1d bias
        "w2": jax.random.uniform(k3, (hidden, out_dim), jnp.float32, -s2, s2),
        "b2": jax.random.uniform(k4, (out_dim,), jnp.float32, -s2, s2),
        "g2": jnp.ones((out_dim,), jnp.float32),
        "be2": jnp.zeros((out_dim,), jnp.float32),
    }


def reference_forward(x, p):
    def layer(h, w, b, g, be):
        z = h @ w + b
        m = z.mean(0, keepdims=True)
        v = ((z - m) ** 2).mean(0, keepdims=True)
        zn = (z - m) / jnp.sqrt(v + EPS) * g + be
        return 0.5 * zn * (1.0 + jax.lax.erf(zn / jnp.sqrt(2.0)))
    h = layer(x, p["w1"], p["b1"], p["g1"], p["be1"])
    return layer(h, p["w2"], p["b2"], p["g2"], p["be2"])


if __name__ == "__main__":
    key = jax.random.PRNGKey(0)
    kx, kp = jax.random.split(key)

    N, in_dim, hidden, out_dim = 8, 32, 1024, 64   # hidden_dim=[1024] as in the module default
    x = jax.random.normal(kx, (N, in_dim), jnp.float32)
    params = init_params(kp, in_dim, hidden, out_dim)

    prep = prepare_params(params, in_dim, hidden, out_dim)   # one-time pad + bf16 cast
    out = inference_mlp_forward(x, prep)
    jax.block_until_ready(out)

    ref = reference_forward(x, params)
    assert out.shape == (N, out_dim)
    # bf16 MXU operands (f32 accumulation) -> slightly looser tolerance vs f32 reference.
    assert jnp.allclose(out, ref, atol=3e-2, rtol=3e-2), float(jnp.max(jnp.abs(out - ref)))

    print("KERNEL_OK")
</pallas_src>

<mosaic_0001>
module attributes {stable_mosaic.version = 11 : i64} {
  func.func @_fused_mlp_kernel(%arg0: i32, %arg1: memref<8x128xbf16, #tpu.memory_space<vmem>>, %arg2: memref<128x1024xbf16, #tpu.memory_space<vmem>>, %arg3: memref<1x1024xf32, #tpu.memory_space<vmem>>, %arg4: memref<1x1024xf32, #tpu.memory_space<vmem>>, %arg5: memref<1x1024xf32, #tpu.memory_space<vmem>>, %arg6: memref<1024x128xbf16, #tpu.memory_space<vmem>>, %arg7: memref<1x128xf32, #tpu.memory_space<vmem>>, %arg8: memref<1x128xf32, #tpu.memory_space<vmem>>, %arg9: memref<1x128xf32, #tpu.memory_space<vmem>>, %arg10: memref<8x128xf32, #tpu.memory_space<vmem>>) attributes {dimension_semantics = [#tpu.dimension_semantics<parallel>], iteration_bounds = array<i64: 1>, scalar_prefetch = 0 : i64, scratch_operands = 0 : i64, tpu.core_type = #tpu.core_type<tc>, window_params = [{pipeline_mode = #tpu.pipeline_mode<synchronous>, transform_indices = @transform_0, window_bounds = array<i64: 8, 128>}, {pipeline_mode = #tpu.pipeline_mode<synchronous>, transform_indices = @transform_1, window_bounds = array<i64: 128, 1024>}, {pipeline_mode = #tpu.pipeline_mode<synchronous>, transform_indices = @transform_2, window_bounds = array<i64: 1, 1024>}, {pipeline_mode = #tpu.pipeline_mode<synchronous>, transform_indices = @transform_3, window_bounds = array<i64: 1, 1024>}, {pipeline_mode = #tpu.pipeline_mode<synchronous>, transform_indices = @transform_4, window_bounds = array<i64: 1, 1024>}, {transform_indices = @transform_5, window_bounds = array<i64: 1024, 128>}, {transform_indices = @transform_6, window_bounds = array<i64: 1, 128>}, {transform_indices = @transform_7, window_bounds = array<i64: 1, 128>}, {transform_indices = @transform_8, window_bounds = array<i64: 1, 128>}, {transform_indices = @transform_9, window_bounds = array<i64: 8, 128>}]} {
    %c0 = arith.constant 0 : index
    %c0_0 = arith.constant 0 : index
    %0 = vector.load %arg1[%c0, %c0_0] : memref<8x128xbf16, #tpu.memory_space<vmem>>, vector<8x128xbf16>
    %c0_1 = arith.constant 0 : index
    %c0_2 = arith.constant 0 : index
    %1 = vector.load %arg2[%c0_1, %c0_2] : memref<128x1024xbf16, #tpu.memory_space<vmem>>, vector<128x1024xbf16>
    %cst = arith.constant dense<0.000000e+00> : vector<8x1024xf32>
    %2 = tpu.matmul %0, %1, %cst {dimension_numbers = #tpu.dot_dimension_numbers<[1], [0], [0], [1], [0, 0, 1, 1], [], []>} : vector<8x128xbf16>, vector<128x1024xbf16>, vector<8x1024xf32> -> vector<8x1024xf32>
    %c0_3 = arith.constant 0 : index
    %c0_4 = arith.constant 0 : index
    %3 = vector.load %arg3[%c0_3, %c0_4] : memref<1x1024xf32, #tpu.memory_space<vmem>>, vector<1x1024xf32>
    %4 = vector.broadcast %3 : vector<1x1024xf32> to vector<8x1024xf32>
    %5 = arith.addf %2, %4 : vector<8x1024xf32>
    %c0_5 = arith.constant 0 : index
    %c0_6 = arith.constant 0 : index
    %6 = vector.load %arg4[%c0_5, %c0_6] : memref<1x1024xf32, #tpu.memory_space<vmem>>, vector<1x1024xf32>
    %c0_7 = arith.constant 0 : index
    %c0_8 = arith.constant 0 : index
    %7 = vector.load %arg5[%c0_7, %c0_8] : memref<1x1024xf32, #tpu.memory_space<vmem>>, vector<1x1024xf32>
    %cst_9 = arith.constant dense<0.000000e+00> : vector<1024xf32>
    %8 = vector.multi_reduction <add>, %5, %cst_9 [0] : vector<8x1024xf32> to vector<1024xf32>
    %9 = vector.shape_cast %8 : vector<1024xf32> to vector<1x1024xf32>
    %cst_10 = arith.constant 1.250000e-01 : f32
    %10 = vector.broadcast %cst_10 : f32 to vector<1x1024xf32>
    %11 = arith.mulf %9, %10 : vector<1x1024xf32>
    %12 = vector.broadcast %11 : vector<1x1024xf32> to vector<8x1024xf32>
    %13 = arith.subf %5, %12 : vector<8x1024xf32>
    %14 = arith.mulf %13, %13 : vector<8x1024xf32>
    %cst_11 = arith.constant dense<0.000000e+00> : vector<1024xf32>
    %15 = vector.multi_reduction <add>, %14, %cst_11 [0] : vector<8x1024xf32> to vector<1024xf32>
    %16 = vector.shape_cast %15 : vector<1024xf32> to vector<1x1024xf32>
    %cst_12 = arith.constant 1.250000e-01 : f32
    %17 = vector.broadcast %cst_12 : f32 to vector<1x1024xf32>
    %18 = arith.mulf %16, %17 : vector<1x1024xf32>
    %cst_13 = arith.constant 9.99999974E-6 : f32
    %19 = vector.broadcast %cst_13 : f32 to vector<1x1024xf32>
    %20 = arith.addf %18, %19 : vector<1x1024xf32>
    %21 = math.rsqrt %20 : vector<1x1024xf32>
    %22 = arith.mulf %6, %21 : vector<1x1024xf32>
    %23 = vector.broadcast %22 : vector<1x1024xf32> to vector<8x1024xf32>
    %24 = arith.mulf %13, %23 : vector<8x1024xf32>
    %25 = vector.broadcast %7 : vector<1x1024xf32> to vector<8x1024xf32>
    %26 = arith.addf %24, %25 : vector<8x1024xf32>
    %cst_14 = arith.constant 5.000000e-01 : f32
    %27 = vector.broadcast %cst_14 : f32 to vector<8x1024xf32>
    %28 = arith.mulf %27, %26 : vector<8x1024xf32>
    %cst_15 = arith.constant 0.707106769 : f32
    %29 = vector.broadcast %cst_15 : f32 to vector<8x1024xf32>
    %30 = arith.mulf %26, %29 : vector<8x1024xf32>
    %31 = math.erf %30 : vector<8x1024xf32>
    %cst_16 = arith.constant 1.000000e+00 : f32
    %32 = vector.broadcast %cst_16 : f32 to vector<8x1024xf32>
    %33 = arith.addf %32, %31 : vector<8x1024xf32>
    %34 = arith.mulf %28, %33 : vector<8x1024xf32>
    %35 = arith.truncf %34 : vector<8x1024xf32> to vector<8x1024xbf16>
    %c0_17 = arith.constant 0 : index
    %c0_18 = arith.constant 0 : index
    %36 = vector.load %arg6[%c0_17, %c0_18] : memref<1024x128xbf16, #tpu.memory_space<vmem>>, vector<1024x128xbf16>
    %cst_19 = arith.constant dense<0.000000e+00> : vector<8x128xf32>
    %37 = tpu.matmul %35, %36, %cst_19 {dimension_numbers = #tpu.dot_dimension_numbers<[1], [0], [0], [1], [0, 0, 1, 1], [], []>} : vector<8x1024xbf16>, vector<1024x128xbf16>, vector<8x128xf32> -> vector<8x128xf32>
    %c0_20 = arith.constant 0 : index
    %c0_21 = arith.constant 0 : index
    %38 = vector.load %arg7[%c0_20, %c0_21] : memref<1x128xf32, #tpu.memory_space<vmem>>, vector<1x128xf32>
    %39 = vector.broadcast %38 : vector<1x128xf32> to vector<8x128xf32>
    %40 = arith.addf %37, %39 : vector<8x128xf32>
    %c0_22 = arith.constant 0 : index
    %c0_23 = arith.constant 0 : index
    %41 = vector.load %arg8[%c0_22, %c0_23] : memref<1x128xf32, #tpu.memory_space<vmem>>, vector<1x128xf32>
    %c0_24 = arith.constant 0 : index
    %c0_25 = arith.constant 0 : index
    %42 = vector.load %arg9[%c0_24, %c0_25] : memref<1x128xf32, #tpu.memory_space<vmem>>, vector<1x128xf32>
    %cst_26 = arith.constant dense<0.000000e+00> : vector<128xf32>
    %43 = vector.multi_reduction <add>, %40, %cst_26 [0] : vector<8x128xf32> to vector<128xf32>
    %44 = vector.shape_cast %43 : vector<128xf32> to vector<1x128xf32>
    %cst_27 = arith.constant 1.250000e-01 : f32
    %45 = vector.broadcast %cst_27 : f32 to vector<1x128xf32>
    %46 = arith.mulf %44, %45 : vector<1x128xf32>
    %47 = vector.broadcast %46 : vector<1x128xf32> to vector<8x128xf32>
    %48 = arith.subf %40, %47 : vector<8x128xf32>
    %49 = arith.mulf %48, %48 : vector<8x128xf32>
    %cst_28 = arith.constant dense<0.000000e+00> : vector<128xf32>
    %50 = vector.multi_reduction <add>, %49, %cst_28 [0] : vector<8x128xf32> to vector<128xf32>
    %51 = vector.shape_cast %50 : vector<128xf32> to vector<1x128xf32>
    %cst_29 = arith.constant 1.250000e-01 : f32
    %52 = vector.broadcast %cst_29 : f32 to vector<1x128xf32>
    %53 = arith.mulf %51, %52 : vector<1x128xf32>
    %cst_30 = arith.constant 9.99999974E-6 : f32
    %54 = vector.broadcast %cst_30 : f32 to vector<1x128xf32>
    %55 = arith.addf %53, %54 : vector<1x128xf32>
    %56 = math.rsqrt %55 : vector<1x128xf32>
    %57 = arith.mulf %41, %56 : vector<1x128xf32>
    %58 = vector.broadcast %57 : vector<1x128xf32> to vector<8x128xf32>
    %59 = arith.mulf %48, %58 : vector<8x128xf32>
    %60 = vector.broadcast %42 : vector<1x128xf32> to vector<8x128xf32>
    %61 = arith.addf %59, %60 : vector<8x128xf32>
    %cst_31 = arith.constant 5.000000e-01 : f32
    %62 = vector.broadcast %cst_31 : f32 to vector<8x128xf32>
    %63 = arith.mulf %62, %61 : vector<8x128xf32>
    %cst_32 = arith.constant 0.707106769 : f32
    %64 = vector.broadcast %cst_32 : f32 to vector<8x128xf32>
    %65 = arith.mulf %61, %64 : vector<8x128xf32>
    %66 = math.erf %65 : vector<8x128xf32>
    %cst_33 = arith.constant 1.000000e+00 : f32
    %67 = vector.broadcast %cst_33 : f32 to vector<8x128xf32>
    %68 = arith.addf %67, %66 : vector<8x128xf32>
    %69 = arith.mulf %63, %68 : vector<8x128xf32>
    %c0_34 = arith.constant 0 : index
    %c0_35 = arith.constant 0 : index
    %70 = vector.load %arg10[%c0_34, %c0_35] : memref<8x128xf32, #tpu.memory_space<vmem>>, vector<8x128xf32>
    tpu.vector_store %arg10[%c0_34, %c0_35], %69 {strides = array<i32>} : memref<8x128xf32, #tpu.memory_space<vmem>>, vector<8x128xf32>,
    return
  }
  func.func @transform_0(%arg0: i32) -> (i32, i32) {
    %c0_i32 = arith.constant 0 : i32
    %c0_i32_0 = arith.constant 0 : i32
    %c0_i32_1 = arith.constant 0 : i32
    return %c0_i32, %c0_i32_0 : i32, i32
  }
  func.func @transform_1(%arg0: i32) -> (i32, i32) {
    %c0_i32 = arith.constant 0 : i32
    %c0_i32_0 = arith.constant 0 : i32
    %c0_i32_1 = arith.constant 0 : i32
    return %c0_i32, %c0_i32_0 : i32, i32
  }
  func.func @transform_2(%arg0: i32) -> (i32, i32) {
    %c0_i32 = arith.constant 0 : i32
    %c0_i32_0 = arith.constant 0 : i32
    %c0_i32_1 = arith.constant 0 : i32
    return %c0_i32, %c0_i32_0 : i32, i32
  }
  func.func @transform_3(%arg0: i32) -> (i32, i32) {
    %c0_i32 = arith.constant 0 : i32
    %c0_i32_0 = arith.constant 0 : i32
    %c0_i32_1 = arith.constant 0 : i32
    return %c0_i32, %c0_i32_0 : i32, i32
  }
  func.func @transform_4(%arg0: i32) -> (i32, i32) {
    %c0_i32 = arith.constant 0 : i32
    %c0_i32_0 = arith.constant 0 : i32
    %c0_i32_1 = arith.constant 0 : i32
    return %c0_i32, %c0_i32_0 : i32, i32
  }
  func.func @transform_5(%arg0: i32) -> (i32, i32) {
    %c0_i32 = arith.constant 0 : i32
    %c0_i32_0 = arith.constant 0 : i32
    return %c0_i32, %arg0 : i32, i32
  }
  func.func @transform_6(%arg0: i32) -> (i32, i32) {
    %c0_i32 = arith.constant 0 : i32
    %c0_i32_0 = arith.constant 0 : i32
    return %c0_i32, %arg0 : i32, i32
  }
  func.func @transform_7(%arg0: i32) -> (i32, i32) {
    %c0_i32 = arith.constant 0 : i32
    %c0_i32_0 = arith.constant 0 : i32
    return %c0_i32, %arg0 : i32, i32
  }
  func.func @transform_8(%arg0: i32) -> (i32, i32) {
    %c0_i32 = arith.constant 0 : i32
    %c0_i32_0 = arith.constant 0 : i32
    return %c0_i32, %arg0 : i32, i32
  }
  func.func @transform_9(%arg0: i32) -> (i32, i32) {
    %c0_i32 = arith.constant 0 : i32
    %c0_i32_0 = arith.constant 0 : i32
    return %c0_i32, %arg0 : i32, i32
  }
}

</mosaic_0001>

<bundles_post_ra>
// kernel: tpu_custom_call.1
= control target key start
LH: loop header
LB: loop body
LE: loop exit
PB: predicated region body
PF: predicated region fallthrough
CT: control target
= control target key end

     0   :  { %14 = vsyncpa [#allocation3], 0  ;;  %s2492_s0 = inlined_call_operand.hbm [shape: bf16[8,128], index: 0, kind: input, shape index: {}]   ;;  %s2493_s1 = inlined_call_operand.hbm [shape: bf16[128,1024], index: 1, kind: input, shape index: {}]   ;;  %s2494_s2 = inlined_call_operand.hbm [shape: f32[1,1024], index: 2, kind: input, shape index: {}]   ;;  %s2495_s3 = inlined_call_operand.hbm [shape: f32[1,1024], index: 3, kind: input, shape index: {}]   ;;  %s2496_s4 = inlined_call_operand.hbm [shape: f32[1,1024], index: 4, kind: input, shape index: {}]   ;;  %s2497_s5 = inlined_call_operand.hbm [shape: bf16[1024,128], index: 5, kind: input, shape index: {}]   ;;  %s2498_s6 = inlined_call_operand.vmem [shape: f32[1,128], index: 6, kind: input, shape index: {}]   ;;  %s2499_s7 = inlined_call_operand.vmem [shape: f32[1,128], index: 7, kind: input, shape index: {}]   ;;  %s2500_s8 = inlined_call_operand.vmem [shape: f32[1,128], index: 8, kind: input, shape index: {}]   ;;  %s2501_s9 = inlined_call_operand.hbm [shape: f32[8,128], index: 9, kind: output, shape index: {}]  }
   0x1   :  { %15 = vsyncpa [#allocation6], 0 }
   0x2   :  { %16 = vsyncpa [#allocation9], 0 }
   0x3   :  { %17 = vsyncpa [#allocation12], 0 }
   0x4   :  { %18 = vsyncpa [#allocation4], 0  ;;  %s2269_s30 = smov [#allocation5]  }
   0x5   :  { %s34_s10 = sshll.u32 %s2269_s30, 4  ;;  %s35_s10 = int_to_ptr.vmem [resolvable:$true] %s34_s10 }
   0x6   :  { %s2127_s11 = scalar_lea.vmem %s35_s10, 8192  ;;  %p2132_p1 = scmp.lt.s32.totalorder %s35_s10, %s35_s10 }
   0x7   :  { %p2128_p0 = scmp.ne.s32.totalorder %s35_s10, %s2127_s11  ;;  %p2133_p2 = scmp.lt.s32.totalorder %s2127_s11, %s2127_s11 }
   0x9   :  { %p2134_p3 = por %p2133_p2, %p2132_p1 }
   0xb   :  { %p2135_p4 = pnand %p2134_p3, %p2128_p0 }
   0xd   :  { %2138 = shalt.err (!%p2135_p4)
}
   0xe   :  { %s2270_s12 = smov 512   ;;  %s2271_s13 = smov 32  }
   0xf   :  { %40 = dma.hbm_to_vmem [thread:$0]  %s2493_s1, 8192, %s35_s10, [#allocation6], %s2270_s12, %s2270_s12, %s2271_s13  }
  0x10   :  { %s2272_s16 = smov [#allocation8]   ;;  %s2273_s18 = smov [#allocation2]  }
  0x11   :  { %s57_s17 = sshll.u32 %s2272_s16, 4  ;;  %s25_s19 = sshll.u32 %s2273_s18, 4  ;;  %s58_s17 = int_to_ptr.vmem [resolvable:$true] %s57_s17  ;;  %s26_s19 = int_to_ptr.vmem [resolvable:$true] %s25_s19 }
  0x12   :  { %s2147_s20 = scalar_lea.vmem %s58_s17, 128  ;;  %p2152_p6 = scmp.lt.s32.totalorder %s58_s17, %s58_s17 }
  0x13   :  { %p2148_p5 = scmp.ne.s32.totalorder %s58_s17, %s2147_s20  ;;  %p2153_p7 = scmp.lt.s32.totalorder %s2147_s20, %s2147_s20 }
  0x15   :  { %p2154_p8 = por %p2153_p7, %p2152_p6 }
  0x17   :  { %p2155_p9 = pnand %p2154_p8, %p2148_p5 }
  0x19   :  { %2158 = shalt.err (!%p2155_p9)
}
  0x1a   :  { %60 = dma.hbm_to_vmem [thread:$0]  %s2495_s3, 128, %s58_s17, [#allocation9]  }
  0x1b   :  { %s2167_s23 = scalar_lea.vmem %s26_s19, 64  ;;  %p2172_p11 = scmp.lt.s32.totalorder %s26_s19, %s26_s19 }
  0x1c   :  { %p2168_p10 = scmp.ne.s32.totalorder %s26_s19, %s2167_s23  ;;  %p2173_p12 = scmp.lt.s32.totalorder %s2167_s23, %s2167_s23 }
  0x1e   :  { %p2174_p13 = por %p2173_p12, %p2172_p11 }
  0x20   :  { %p2175_p0 = pnand %p2174_p13, %p2168_p10 }
  0x22   :  { %2178 = shalt.err (!%p2175_p0)
}
  0x23   :  { %28 = dma.hbm_to_vmem [thread:$0]  %s2492_s0, 64, %s26_s19, [#allocation3]  }
  0x24   :  { %s2274_s25 = smov [#allocation7]   ;;  %s2275_s27 = smov [#allocation10]  }
  0x25   :  { %s47_s26 = sshll.u32 %s2274_s25, 4  ;;  %s67_s28 = sshll.u32 %s2275_s27, 4  ;;  %s48_s26 = int_to_ptr.vmem [resolvable:$true] %s47_s26  ;;  %s68_s28 = int_to_ptr.vmem [resolvable:$true] %s67_s28 }
  0x26   :  { %s2187_s29 = scalar_lea.vmem %s48_s26, 128  ;;  %p2192_p2 = scmp.lt.s32.totalorder %s48_s26, %s48_s26 }
  0x27   :  { %p2188_p1 = scmp.ne.s32.totalorder %s48_s26, %s2187_s29  ;;  %p2193_p3 = scmp.lt.s32.totalorder %s2187_s29, %s2187_s29 }
  0x29   :  { %p2194_p4 = por %p2193_p3, %p2192_p2 }
  0x2b   :  { %p2195_p5 = pnand %p2194_p4, %p2188_p1 }
  0x2d   :  { %2198 = shalt.err (!%p2195_p5)
}
  0x2e   :  { %50 = dma.hbm_to_vmem [thread:$0]  %s2494_s2, 128, %s48_s26, [#allocation6]  }
  0x2f   :  { %s2207_s10 = scalar_lea.vmem %s68_s28, 128  ;;  %p2212_p7 = scmp.lt.s32.totalorder %s68_s28, %s68_s28 }
  0x30   :  { %p2208_p6 = scmp.ne.s32.totalorder %s68_s28, %s2207_s10  ;;  %p2213_p8 = scmp.lt.s32.totalorder %s2207_s10, %s2207_s10 }
  0x32   :  { %p2214_p9 = por %p2213_p8, %p2212_p7 }
  0x34   :  { %p2215_p10 = pnand %p2214_p9, %p2208_p6 }
  0x36   :  { %2218 = shalt.err (!%p2215_p10)
}
  0x37   :  { %70 = dma.hbm_to_vmem [thread:$0]  %s2496_s4, 128, %s68_s28, [#allocation9]  }
  0x38   :  { %s2276_s12 = smov [#allocation11]  }
  0x39   :  { %s76_s13 = sshll.u32 %s2276_s12, 4  ;;  %s77_s13 = int_to_ptr.vmem [resolvable:$true] %s76_s13 }
  0x3a   :  { %s2227_s14 = scalar_lea.vmem %s77_s13, 8192  ;;  %p2232_p12 = scmp.lt.s32.totalorder %s77_s13, %s77_s13 }
  0x3b   :  { %p2228_p11 = scmp.ne.s32.totalorder %s77_s13, %s2227_s14  ;;  %p2233_p13 = scmp.lt.s32.totalorder %s2227_s14, %s2227_s14 }
  0x3d   :  { %p2234_p0 = por %p2233_p13, %p2232_p12 }
  0x3f   :  { %p2235_p1 = pnand %p2234_p0, %p2228_p11 }
  0x41   :  { %2238 = shalt.err (!%p2235_p1)
}
  0x42   :  { %s2277_s2 = smov 64   ;;  %s2278_s15 = smov 4  }
  0x43   :  { %82 = dma.hbm_to_vmem [thread:$0]  %s2497_s5, 8192, %s77_s13, [#allocation12], %s2277_s2, %s2277_s2, %s2278_s15  }
  0x44   :  { %2259 = dma.done.wait [#allocation3], 64  }
  0x45   :  { %2260 = vsyncadd [#allocation3], 4294967232 }
  0x46   :  { %2261 = dma.done.wait [#allocation6], 8320  }
  0x47   :  { %2262 = vsyncadd [#allocation6], 4294958976 }
  0x48   :  { %2263 = dma.done.wait [#allocation9], 256  }
  0x49   :  { %2264 = vsyncadd [#allocation9], 4294967040 }
  0x4a   :  { %2265 = dma.done.wait [#allocation12], 8192  }
  0x4b   :  { %2266 = vsyncadd [#allocation12], 4294959104  ;;  %v2279_v0 = vmov 0   ;;  %v165_v1 = vld [vmem:[#allocation5 + $0x1c0] sm:$0xff]  ;;  %v166_v3 = vld [vmem:[#allocation5 + $0x1c8] sm:$0xff]  ;;  %s2281_s21 = smov [#allocation13]  }
  0x4c   :  { %567 = vmatprep.mubr.bf16.mxu0 %v2279_v0  ;;  %608 = vmatprep.mubr.bf16.mxu1 %v2279_v0  ;;  %v169_v2 = vld [vmem:[#allocation5 + $0x1e0] sm:$0xff]  ;;  %v170_v5 = vld [vmem:[#allocation5 + $0x1e8] sm:$0xff]  ;;  %v167_v60 = vld [vmem:[#allocation5 + $0x1d0] sm:$0xff]  ;;  %s1776_s22 = sshll.u32 %s2281_s21, 4  ;;  %s1777_s22 = int_to_ptr.vmem [resolvable:$true] %s1776_s22 }
  0x4d   :  { %v1845_v4 = vcombine.high %v165_v1, %v169_v2  ;;  %v1844_v6 = vcombine.low %v165_v1, %v169_v2  ;;  %v157_v7 = vld [vmem:[#allocation5 + $0x180] sm:$0xff]  ;;  %v1847_v9 = vcombine.high %v166_v3, %v170_v5  ;;  %v1846_v10 = vcombine.low %v166_v3, %v170_v5  ;;  %v158_v12 = vld [vmem:[#allocation5 + $0x188] sm:$0xff]  ;;  %v171_v61 = vld [vmem:[#allocation5 + $0x1f0] sm:$0xff]  ;;  %p2244_p3 = scmp.lt.s32.totalorder %s1777_s22, %s1777_s22 }
  0x4e   :  { %v161_v8 = vld [vmem:[#allocation5 + $0x1a0] sm:$0xff]  ;;  %v162_v13 = vld [vmem:[#allocation5 + $0x1a8] sm:$0xff]  ;;  %v168_v1 = vld [vmem:[#allocation5 + $0x1d8] sm:$0xff] }
  0x4f   :  { %v1837_v11 = vcombine.high %v157_v7, %v161_v8  ;;  %v149_v14 = vld [vmem:[#allocation5 + $0x140] sm:$0xff]  ;;  %535 = vmatprep.subr.bf16.mxu0 %v1845_v4  ;;  %v1839_v15 = vcombine.high %v158_v12, %v162_v13  ;;  %v150_v17 = vld [vmem:[#allocation5 + $0x148] sm:$0xff]  ;;  %576 = vmatprep.subr.bf16.mxu1 %v1847_v9  ;;  %v1836_v19 = vcombine.low %v157_v7, %v161_v8  ;;  %v172_v2 = vld [vmem:[#allocation5 + $0x1f8] sm:$0xff] }
  0x50   :  { %v153_v16 = vld [vmem:[#allocation5 + $0x160] sm:$0xff]  ;;  %v154_v18 = vld [vmem:[#allocation5 + $0x168] sm:$0xff]  ;;  %536 = vmatpush1.bf16.msra.mxu0 %v1844_v6  ;;  %577 = vmatpush1.bf16.msra.mxu1 %v1846_v10  ;;  %v1838_v20 = vcombine.low %v158_v12, %v162_v13  ;;  %v159_v5 = vld [vmem:[#allocation5 + $0x190] sm:$0xff]  ;;  %v1849_v8 = vcombine.high %v167_v60, %v171_v61  ;;  %v1851_v12 = vcombine.high %v168_v1, %v172_v2 }
  0x51   :  { %537 = vmatprep.subr.bf16.mxu0 %v1837_v11  ;;  %v1829_v21 = vcombine.high %v149_v14, %v153_v16  ;;  %578 = vmatprep.subr.bf16.mxu1 %v1839_v15  ;;  %v1831_v22 = vcombine.high %v150_v17, %v154_v18  ;;  %v141_v23 = vld [vmem:[#allocation5 + $0x100] sm:$0xff]  ;;  %v142_v25 = vld [vmem:[#allocation5 + $0x108] sm:$0xff]  ;;  %v1828_v27 = vcombine.low %v149_v14, %v153_v16  ;;  %v163_v6 = vld [vmem:[#allocation5 + $0x1b0] sm:$0xff] }
  0x52   :  { %v145_v24 = vld [vmem:[#allocation5 + $0x120] sm:$0xff]  ;;  %v146_v26 = vld [vmem:[#allocation5 + $0x128] sm:$0xff]  ;;  %v1830_v28 = vcombine.low %v150_v17, %v154_v18  ;;  %v160_v9 = vld [vmem:[#allocation5 + $0x198] sm:$0xff]  ;;  %v1848_v13 = vcombine.low %v167_v60, %v171_v61  ;;  %v1850_v16 = vcombine.low %v168_v1, %v172_v2  ;;  %v1841_v17 = vcombine.high %v159_v5, %v163_v6 }
  0x53   :  { %v1821_v29 = vcombine.high %v141_v23, %v145_v24  ;;  %v1823_v30 = vcombine.high %v142_v25, %v146_v26  ;;  %v133_v31 = vld [vmem:[#allocation5 + $0xc0] sm:$0xff]  ;;  %v134_v33 = vld [vmem:[#allocation5 + $0xc8] sm:$0xff]  ;;  %v1820_v35 = vcombine.low %v141_v23, %v145_v24  ;;  %v1822_v36 = vcombine.low %v142_v25, %v146_v26  ;;  %v164_v10 = vld [vmem:[#allocation5 + $0x1b8] sm:$0xff] }
  0x54   :  { %538 = vmatpush1.bf16.msra.mxu0 %v1836_v19  ;;  %579 = vmatpush1.bf16.msra.mxu1 %v1838_v20  ;;  %v137_v32 = vld [vmem:[#allocation5 + $0xe0] sm:$0xff]  ;;  %v138_v34 = vld [vmem:[#allocation5 + $0xe8] sm:$0xff]  ;;  %v2352_v11 = vld [vmem:[#allocation2] sm:$0xf]  ;;  %v1843_v20 = vcombine.high %v160_v9, %v164_v10  ;;  %v1842_v24 = vcombine.low %v160_v9, %v164_v10 }
  0x55   :  { %539 = vmatprep.subr.bf16.mxu0 %v1829_v21  ;;  %580 = vmatprep.subr.bf16.mxu1 %v1831_v22  ;;  %v1813_v37 = vcombine.high %v133_v31, %v137_v32  ;;  %v1815_v38 = vcombine.high %v134_v33, %v138_v34  ;;  %v125_v39 = vld [vmem:[#allocation5 + $0x80] sm:$0xff]  ;;  %v126_v41 = vld [vmem:[#allocation5 + $0x88] sm:$0xff]  ;;  %v1812_v43 = vcombine.low %v133_v31, %v137_v32  ;;  %v151_v14 = vld [vmem:[#allocation5 + $0x150] sm:$0xff] }
  0x56   :  { %v129_v40 = vld [vmem:[#allocation5 + $0xa0] sm:$0xff]  ;;  %v130_v42 = vld [vmem:[#allocation5 + $0xa8] sm:$0xff]  ;;  %v1814_v44 = vcombine.low %v134_v33, %v138_v34  ;;  %v155_v15 = vld [vmem:[#allocation5 + $0x170] sm:$0xff]  ;;  %v1840_v21 = vcombine.low %v159_v5, %v163_v6 }
  0x57   :  { %v1805_v45 = vcombine.high %v125_v39, %v129_v40  ;;  %v1807_v46 = vcombine.high %v126_v41, %v130_v42  ;;  %v117_v47 = vld [vmem:[#allocation5 + $0x40] sm:$0xff]  ;;  %v118_v49 = vld [vmem:[#allocation5 + $0x48] sm:$0xff]  ;;  %v1804_v51 = vcombine.low %v125_v39, %v129_v40  ;;  %v1806_v53 = vcombine.low %v126_v41, %v130_v42  ;;  %v152_v18 = vld [vmem:[#allocation5 + $0x158] sm:$0xff] }
  0x58   :  { %540 = vmatpush1.bf16.msra.mxu0 %v1828_v27  ;;  %581 = vmatpush1.bf16.msra.mxu1 %v1830_v28  ;;  %v121_v48 = vld [vmem:[#allocation5 + $0x60] sm:$0xff]  ;;  %v122_v50 = vld [vmem:[#allocation5 + $0x68] sm:$0xff]  ;;  %v156_v19 = vld [vmem:[#allocation5 + $0x178] sm:$0xff]  ;;  %v1833_v25 = vcombine.high %v151_v14, %v155_v15 }
  0x59   :  { %541 = vmatprep.subr.bf16.mxu0 %v1821_v29  ;;  %582 = vmatprep.subr.bf16.mxu1 %v1823_v30  ;;  %v109_v52 = vld [vmem:[#allocation5] sm:$0xff]  ;;  %v1797_v54 = vcombine.high %v117_v47, %v121_v48  ;;  %v110_v56 = vld [vmem:[#allocation5 + $0x8] sm:$0xff]  ;;  %v1799_v58 = vcombine.high %v118_v49, %v122_v50  ;;  %v1796_v59 = vcombine.low %v117_v47, %v121_v48  ;;  %v143_v22 = vld [vmem:[#allocation5 + $0x110] sm:$0xff] }
  0x5a   :  { %v113_v55 = vld [vmem:[#allocation5 + $0x20] sm:$0xff]  ;;  %v114_v57 = vld [vmem:[#allocation5 + $0x28] sm:$0xff]  ;;  %v1798_v62 = vcombine.low %v118_v49, %v122_v50  ;;  %v147_v23 = vld [vmem:[#allocation5 + $0x130] sm:$0xff]  ;;  %v1835_v28 = vcombine.high %v152_v18, %v156_v19  ;;  %v1832_v29 = vcombine.low %v151_v14, %v155_v15  ;;  %v1834_v32 = vcombine.low %v152_v18, %v156_v19 }
  0x5b   :  { %v1789_v63 = vcombine.high %v109_v52, %v113_v55  ;;  %v1791_v3 = vcombine.high %v110_v56, %v114_v57  ;;  %v1788_v4 = vcombine.low %v109_v52, %v113_v55  ;;  %v1790_v7 = vcombine.low %v110_v56, %v114_v57  ;;  %v144_v26 = vld [vmem:[#allocation5 + $0x118] sm:$0xff]  ;;  %v135_v30 = vld [vmem:[#allocation5 + $0xd0] sm:$0xff]  ;;  %v2025_v9 = vld [vmem:[#allocation11 + $0x30] sm:$0xff]  }
  0x5c   :  { %542 = vmatpush1.bf16.msra.mxu0 %v1820_v35  ;;  %583 = vmatpush1.bf16.msra.mxu1 %v1822_v36  ;;  %v148_v27 = vld [vmem:[#allocation5 + $0x138] sm:$0xff]  ;;  %v139_v31 = vld [vmem:[#allocation5 + $0xf0] sm:$0xff]  ;;  %v1825_v33 = vcombine.high %v143_v22, %v147_v23  ;;  %v2026_v10 = vld [vmem:[#allocation11 + $0xb0] sm:$0xff]  }
  0x5d   :  { %543 = vmatprep.subr.bf16.mxu0 %v1813_v37  ;;  %584 = vmatprep.subr.bf16.mxu1 %v1815_v38  ;;  %v136_v34 = vld [vmem:[#allocation5 + $0xd8] sm:$0xff]  ;;  %v1827_v36 = vcombine.high %v144_v26, %v148_v27  ;;  %v1824_v37 = vcombine.low %v143_v22, %v147_v23  ;;  %v127_v38 = vld [vmem:[#allocation5 + $0x90] sm:$0xff]  ;;  %v1826_v40 = vcombine.low %v144_v26, %v148_v27  ;;  %v2029_v14 = vld [vmem:[#allocation11 + $0x28] sm:$0xff]  }
  0x5e   :  { %v140_v35 = vld [vmem:[#allocation5 + $0xf8] sm:$0xff]  ;;  %v131_v39 = vld [vmem:[#allocation5 + $0xb0] sm:$0xff]  ;;  %v2039_v23 = vld [vmem:[#allocation11 + $0x50] sm:$0xff]  }
  0x5f   :  { %v128_v41 = vld [vmem:[#allocation5 + $0x98] sm:$0xff]  ;;  %v1818_v47 = vcombine.low %v136_v34, %v140_v35  ;;  %v1809_v48 = vcombine.high %v127_v38, %v131_v39  ;;  %v1808_v52 = vcombine.low %v127_v38, %v131_v39  ;;  %v2021_v5 = vld [vmem:[#allocation11 + $0x38] sm:$0xff]   ;;  %v2042_v26 = vld [vmem:[#allocation11 + $0x90] sm:$0xff]  }
  0x60   :  { %544 = vmatpush1.bf16.msra.mxu0 %v1812_v43  ;;  %585 = vmatpush1.bf16.msra.mxu1 %v1814_v44  ;;  %v132_v42 = vld [vmem:[#allocation5 + $0xb8] sm:$0xff]  ;;  %v1819_v43 = vcombine.high %v136_v34, %v140_v35  ;;  %v1816_v44 = vcombine.low %v135_v30, %v139_v31  ;;  %v2022_v6 = vld [vmem:[#allocation11 + $0xb8] sm:$0xff]   ;;  %v2043_v27 = vld [vmem:[#allocation11 + $0x48] sm:$0xff]  }
  0x61   :  { %545 = vmatprep.subr.bf16.mxu0 %v1805_v45  ;;  %586 = vmatprep.subr.bf16.mxu1 %v1807_v46  ;;  %v119_v45 = vld [vmem:[#allocation5 + $0x50] sm:$0xff]  ;;  %v120_v49 = vld [vmem:[#allocation5 + $0x58] sm:$0xff]  ;;  %v1810_v55 = vcombine.low %v128_v41, %v132_v42  ;;  %v2365_v38 = vld [vmem:[#allocation7] sm:$0xff] }
  0x62   :  { %v123_v46 = vld [vmem:[#allocation5 + $0x70] sm:$0xff]  ;;  %v124_v50 = vld [vmem:[#allocation5 + $0x78] sm:$0xff] }
  0x63   :  { %v1801_v56 = vcombine.high %v119_v45, %v123_v46  ;;  %v112_v57 = vld [vmem:[#allocation5 + $0x18] sm:$0xff]  ;;  %v1800_v60 = vcombine.low %v119_v45, %v123_v46  ;;  %v1802_v61 = vcombine.low %v120_v49, %v124_v50  ;;  %v2035_v19 = vld [vmem:[#allocation11 + $0x58] sm:$0xff]  }
  0x64   :  { %546 = vmatpush1.bf16.msra.mxu0 %v1804_v51  ;;  %587 = vmatpush1.bf16.msra.mxu1 %v1806_v53  ;;  %v1811_v51 = vcombine.high %v128_v41, %v132_v42  ;;  %v111_v53 = vld [vmem:[#allocation5 + $0x10] sm:$0xff]  ;;  %v2031_v15 = vld [vmem:[#allocation11 + $0x60] sm:$0xff]  }
  0x65   :  { %547 = vmatprep.subr.bf16.mxu0 %v1797_v54  ;;  %588 = vmatprep.subr.bf16.mxu1 %v1799_v58  ;;  %v115_v54 = vld [vmem:[#allocation5 + $0x30] sm:$0xff]  ;;  %v116_v58 = vld [vmem:[#allocation5 + $0x38] sm:$0xff] }
  0x66   :  { %v1792_v1 = vcombine.low %v111_v53, %v115_v54  ;;  %v1794_v2 = vcombine.low %v112_v57, %v116_v58  ;;  %v2034_v18 = vld [vmem:[#allocation11 + $0xa0] sm:$0xff]   ;;  %v2038_v22 = vld [vmem:[#allocation11 + $0x98] sm:$0xff]  }
  0x67   :  { %v2049_v35 = vld [vmem:[#allocation11] sm:$0xff]   ;;  %v2051_v42 = vld [vmem:[#allocation11 + $0x178] sm:$0xff]  }
  0x68   :  { %548 = vmatpush1.bf16.msra.mxu0 %v1796_v59  ;;  %589 = vmatpush1.bf16.msra.mxu1 %v1798_v62  ;;  %v1803_v59 = vcombine.high %v120_v49, %v124_v50  ;;  %v1793_v62 = vcombine.high %v111_v53, %v115_v54 }
  0x69   :  { %549 = vmatprep.subr.bf16.mxu0 %v1789_v63  ;;  %590 = vmatprep.subr.bf16.mxu1 %v1791_v3  ;;  %v1795_v63 = vcombine.high %v112_v57, %v116_v58  ;;  %v2019_v3 = vld [vmem:[#allocation11 + $0x78] sm:$0xff]  }
  0x6c   :  { %550 = vmatpush1.bf16.msra.mxu0 %v1788_v4  ;;  %591 = vmatpush1.bf16.msra.mxu1 %v1790_v7  ;;  %v2020_v4 = vld [vmem:[#allocation11 + $0xf8] sm:$0xff]   ;;  %v2023_v7 = vld [vmem:[#allocation11 + $0x70] sm:$0xff]  }
  0x6d   :  { %617 = vmatprep.subr.bf16.mxu0 %v1849_v8  ;;  %658 = vmatprep.subr.bf16.mxu1 %v1851_v12  ;;  %v2024_v8 = vld [vmem:[#allocation11 + $0xf0] sm:$0xff]   ;;  %v2027_v12 = vld [vmem:[#allocation11 + $0x68] sm:$0xff]  }
  0x6f   :  { %568 = vmatmul.mubr.bf16.vlgmr.msra.gmra.mxu0 %v2352_v11  ;;  %609 = vmatmul.mubr.bf16.vlgmr.msra.gmra.mxu1 %v2352_v11 }
  0x70   :  { %618 = vmatpush1.bf16.msra.mxu0 %v1848_v13  ;;  %659 = vmatpush1.bf16.msra.mxu1 %v1850_v16  ;;  %v2028_v13 = vld [vmem:[#allocation11 + $0xe8] sm:$0xff]   ;;  %v2032_v16 = vld [vmem:[#allocation11 + $0xe0] sm:$0xff]  }
  0x71   :  { %619 = vmatprep.subr.bf16.mxu0 %v1841_v17  ;;  %660 = vmatprep.subr.bf16.mxu1 %v1843_v20  ;;  %v2033_v17 = vld [vmem:[#allocation11 + $0x20] sm:$0xff]   ;;  %v2036_v20 = vld [vmem:[#allocation11 + $0xd8] sm:$0xff]  }
  0x72   :  { %649 = vmatprep.mubr.bf16.mxu0 %v2279_v0  ;;  %690 = vmatprep.mubr.bf16.mxu1 %v2279_v0  ;;  %v1817_v0 = vcombine.high %v135_v30, %v139_v31  ;;  %v2045_v30 = vld [vmem:[#allocation11 + $0x8] sm:$0xff]  }
  0x73   :  { %v2046_v31 = vld [vmem:[#allocation11 + $0x88] sm:$0xff]  }
  0x74   :  { %620 = vmatpush1.bf16.msra.mxu0 %v1840_v21  ;;  %661 = vmatpush1.bf16.msra.mxu1 %v1842_v24  ;;  %v2037_v21 = vld [vmem:[#allocation11 + $0x18] sm:$0xff]   ;;  %v2040_v24 = vld [vmem:[#allocation11 + $0xd0] sm:$0xff]  }
  0x75   :  { %621 = vmatprep.subr.bf16.mxu0 %v1833_v25  ;;  %662 = vmatprep.subr.bf16.mxu1 %v1835_v28  ;;  %v2041_v25 = vld [vmem:[#allocation11 + $0x10] sm:$0xff]   ;;  %v2044_v28 = vld [vmem:[#allocation11 + $0xc8] sm:$0xff]  }
  0x78   :  { %622 = vmatpush1.bf16.msra.mxu0 %v1832_v29  ;;  %663 = vmatpush1.bf16.msra.mxu1 %v1834_v32  ;;  %v175_v29 = vlaneseq  ;;  %v2047_v32 = vld [vmem:[#allocation11 + $0x40] sm:$0xff]  }
  0x79   :  { %623 = vmatprep.subr.bf16.mxu0 %v1825_v33  ;;  %664 = vmatprep.subr.bf16.mxu1 %v1827_v36  ;;  %v2048_v33 = vld [vmem:[#allocation11 + $0xc0] sm:$0xff]  }
  0x7a   :  { %v2360_v34 = vshrl.u32 %v175_v29, 7  ;;  %v2050_v36 = vld [vmem:[#allocation11 + $0x80] sm:$0xff]  }
  0x7c   :  { %624 = vmatpush1.bf16.msra.mxu0 %v1824_v37  ;;  %665 = vmatpush1.bf16.msra.mxu1 %v1826_v40  ;;  %v2363_v37 = vsub.s32 0, %v2360_v34  ;;  %v2368_v39 = vsub.s32 2, %v2360_v34  ;;  %v2371_v40 = vsub.s32 1, %v2360_v34  ;;  %v2396_v29 = vsub.s32 6, %v2360_v34 }
  0x7d   :  { %625 = vmatprep.subr.bf16.mxu0 %v1817_v0  ;;  %666 = vmatprep.subr.bf16.mxu1 %v1819_v43  ;;  %v2374_v0 = vsub.s32 3, %v2360_v34  ;;  %v2052_v43 = vld [vmem:[#allocation11 + $0x1f8] sm:$0xff]  }
  0x7e   :  { %v178_v41 = vrot.slane %v2365_v38, %v2363_v37  ;;  %v182_v45 = vrot.slane %v2365_v38, %v2371_v40 }
  0x80   :  { %626 = vmatpush1.bf16.msra.mxu0 %v1816_v44  ;;  %667 = vmatpush1.bf16.msra.mxu1 %v1818_v47  ;;  %v186_v44 = vrot.slane %v2365_v38, %v2368_v39  ;;  %v190_v47 = vrot.slane %v2365_v38, %v2374_v0 }
  0x81   :  { %627 = vmatprep.subr.bf16.mxu0 %v1809_v48  ;;  %668 = vmatprep.subr.bf16.mxu1 %v1811_v51 }
  0x84   :  { %628 = vmatpush1.bf16.msra.mxu0 %v1808_v52  ;;  %669 = vmatpush1.bf16.msra.mxu1 %v1810_v55 }
  0x85   :  { %629 = vmatprep.subr.bf16.mxu0 %v1801_v56  ;;  %670 = vmatprep.subr.bf16.mxu1 %v1803_v59 }
  0x88   :  { %630 = vmatpush1.bf16.msra.mxu0 %v1800_v60  ;;  %671 = vmatpush1.bf16.msra.mxu1 %v1802_v61 }
  0x89   :  { %631 = vmatprep.subr.bf16.mxu0 %v1793_v62  ;;  %672 = vmatprep.subr.bf16.mxu1 %v1795_v63 }
  0x8c   :  { %632 = vmatpush1.bf16.msra.mxu0 %v1792_v1  ;;  %673 = vmatpush1.bf16.msra.mxu1 %v1794_v2 }
  0x8d   :  { %1918 = vmatprep.subr.bf16.mxu0 %v2019_v3  ;;  %1940 = vmatprep.subr.bf16.mxu1 %v2020_v4 }
  0x8f   :  { %650 = vmatmul.mubr.bf16.vlgmr.msra.gmra.mxu0 %v2352_v11  ;;  %691 = vmatmul.mubr.bf16.vlgmr.msra.gmra.mxu1 %v2352_v11  ;;  %v2030_v11 = vld [vmem:[#allocation11 + $0xa8] sm:$0xff]  }
  0x90   :  { %1919 = vmatpush3.bf16.msra.mxu0 %v2021_v5  ;;  %1941 = vmatpush3.bf16.msra.mxu1 %v2022_v6 }
  0x91   :  { %1920 = vmatprep.subr.bf16.mxu0 %v2023_v7  ;;  %1942 = vmatprep.subr.bf16.mxu1 %v2024_v8 }
  0x94   :  { %1921 = vmatpush3.bf16.msra.mxu0 %v2025_v9  ;;  %1943 = vmatpush3.bf16.msra.mxu1 %v2026_v10 }
  0x95   :  { %1922 = vmatprep.subr.bf16.mxu0 %v2027_v12  ;;  %1944 = vmatprep.subr.bf16.mxu1 %v2028_v13 }
  0x98   :  { %1923 = vmatpush3.bf16.msra.mxu0 %v2029_v14  ;;  %1945 = vmatpush3.bf16.msra.mxu1 %v2030_v11 }
  0x99   :  { %1924 = vmatprep.subr.bf16.mxu0 %v2031_v15  ;;  %1946 = vmatprep.subr.bf16.mxu1 %v2032_v16 }
  0x9c   :  { %1925 = vmatpush3.bf16.msra.mxu0 %v2033_v17  ;;  %1947 = vmatpush3.bf16.msra.mxu1 %v2034_v18 }
  0x9d   :  { %1926 = vmatprep.subr.bf16.mxu0 %v2035_v19  ;;  %1948 = vmatprep.subr.bf16.mxu1 %v2036_v20 }
  0xa0   :  { %1927 = vmatpush3.bf16.msra.mxu0 %v2037_v21  ;;  %1949 = vmatpush3.bf16.msra.mxu1 %v2038_v22 }
  0xa1   :  { %1928 = vmatprep.subr.bf16.mxu0 %v2039_v23  ;;  %1950 = vmatprep.subr.bf16.mxu1 %v2040_v24 }
  0xa4   :  { %1929 = vmatpush3.bf16.msra.mxu0 %v2041_v25  ;;  %1951 = vmatpush3.bf16.msra.mxu1 %v2042_v26 }
  0xa5   :  { %1930 = vmatprep.subr.bf16.mxu0 %v2043_v27  ;;  %1952 = vmatprep.subr.bf16.mxu1 %v2044_v28  ;;  %v2391_v27 = vsub.s32 4, %v2360_v34 }
  0xa8   :  { %1931 = vmatpush3.bf16.msra.mxu0 %v2045_v30  ;;  %1953 = vmatpush3.bf16.msra.mxu1 %v2046_v31  ;;  %v2401_v31 = vsub.s32 5, %v2360_v34 }
  0xa9   :  { %1932 = vmatprep.subr.bf16.mxu0 %v2047_v32  ;;  %1954 = vmatprep.subr.bf16.mxu1 %v2048_v33  ;;  %v2406_v33 = vsub.s32 7, %v2360_v34 }
  0xac   :  { %1933 = vmatpush3.bf16.msra.mxu0 %v2049_v35  ;;  %1955 = vmatpush3.bf16.msra.mxu1 %v2050_v36  ;;  %v194_v36 = vrot.slane %v2365_v38, %v2391_v27 }
  0xad   :  { %1962 = vmatprep.subr.bf16.mxu0 %v2051_v42  ;;  %1984 = vmatprep.subr.bf16.mxu1 %v2052_v43  ;;  %v202_v42 = vrot.slane %v2365_v38, %v2396_v29 }
 0x12f   :  { %v569_v46 = vpop.f32.mrf.mxu0  ;;  %v610_v49 = vpop.f32.mrf.mxu1 }
 0x130   :  { %v570_v48 = vadd.f32 %v569_v46, %v178_v41  ;;  %v611_v50 = vadd.f32 %v610_v49, %v186_v44  ;;  %v198_v44 = vrot.slane %v2365_v38, %v2401_v31 }
 0x131   :  { %v571_v51 = vpop.f32.mrf.mxu0  ;;  %v612_v54 = vpop.f32.mrf.mxu1 }
 0x132   :  { %v701_v52 = vrot.slane %v570_v48, 4  ;;  %v572_v53 = vadd.f32 %v571_v51, %v182_v45  ;;  %v713_v55 = vrot.slane %v611_v50, 4  ;;  %v613_v56 = vadd.f32 %v612_v54, %v190_v47 }
 0x133   :  { %v573_v57 = vpop.f32.mrf.mxu0  ;;  %v614_v60 = vpop.f32.mrf.mxu1  ;;  %v206_v47 = vrot.slane %v2365_v38, %v2406_v33 }
 0x134   :  { %v702_v58 = vadd.f32 %v701_v52, %v570_v48  ;;  %v707_v59 = vrot.slane %v572_v53, 4  ;;  %v714_v61 = vadd.f32 %v713_v55, %v611_v50  ;;  %v719_v62 = vrot.slane %v613_v56, 4 }
 0x135   :  { %v574_v63 = vpop.f32.mrf.mxu0  ;;  %v615_v3 = vpop.f32.mrf.mxu1 }
 0x136   :  { %v703_v1 = vrot.slane %v702_v58, 2  ;;  %v708_v2 = vadd.f32 %v707_v59, %v572_v53  ;;  %v715_v4 = vrot.slane %v714_v61, 2  ;;  %v720_v5 = vadd.f32 %v719_v62, %v613_v56 }
 0x138   :  { %v704_v6 = vadd.f32 %v703_v1, %v702_v58  ;;  %v709_v7 = vrot.slane %v708_v2, 2  ;;  %v716_v8 = vadd.f32 %v715_v4, %v714_v61  ;;  %v721_v9 = vrot.slane %v720_v5, 2 }
 0x13a   :  { %v710_v10 = vadd.f32 %v709_v7, %v708_v2  ;;  %v722_v12 = vadd.f32 %v721_v9, %v720_v5  ;;  %v705_v13 = vrot.slane %v704_v6, 1  ;;  %v717_v11 = vrot.slane %v716_v8, 1 }
 0x13c   :  { %v711_v14 = vrot.slane %v710_v10, 1  ;;  %v723_v15 = vrot.slane %v722_v12, 1  ;;  %v706_v18 = vadd.f32 %v705_v13, %v704_v6  ;;  %v718_v19 = vadd.f32 %v717_v11, %v716_v8 }
 0x13e   :  { %v712_v16 = vadd.f32 %v711_v14, %v710_v10  ;;  %v724_v17 = vadd.f32 %v723_v15, %v722_v12  ;;  %v749_v22 = vmul.f32 0.125, %v706_v18  ;;  %v751_v23 = vmul.f32 0.125, %v718_v19 }
 0x140   :  { %v750_v20 = vmul.f32 0.125, %v712_v16  ;;  %v752_v21 = vmul.f32 0.125, %v724_v17  ;;  %v2388_v26 = vsub.f32 %v570_v48, %v749_v22  ;;  %v2393_v28 = vsub.f32 %v611_v50, %v751_v23 }
 0x142   :  { %v2384_v24 = vsub.f32 %v572_v53, %v750_v20  ;;  %v2386_v25 = vsub.f32 %v613_v56, %v752_v21  ;;  %v765_v35 = vmul.f32 %v2388_v26, %v2388_v26  ;;  %v767_v41 = vmul.f32 %v2393_v28, %v2393_v28 }
 0x144   :  { %v766_v30 = vmul.f32 %v2384_v24, %v2384_v24  ;;  %v768_v32 = vmul.f32 %v2386_v25, %v2386_v25  ;;  %v773_v48 = vrot.slane %v765_v35, 4  ;;  %v785_v51 = vrot.slane %v767_v41, 4 }
 0x146   :  { %v779_v43 = vrot.slane %v766_v30, 4  ;;  %v791_v45 = vrot.slane %v768_v32, 4  ;;  %v774_v62 = vadd.f32 %v773_v48, %v765_v35  ;;  %v786_v3 = vadd.f32 %v785_v51, %v767_v41 }
 0x148   :  { %v780_v54 = vadd.f32 %v779_v43, %v766_v30  ;;  %v792_v58 = vadd.f32 %v791_v45, %v768_v32  ;;  %v775_v14 = vrot.slane %v774_v62, 2  ;;  %v787_v16 = vrot.slane %v786_v3, 2 }
 0x14a   :  { %v781_v6 = vrot.slane %v780_v54, 2  ;;  %v793_v10 = vrot.slane %v792_v58, 2  ;;  %v776_v32 = vadd.f32 %v775_v14, %v774_v62  ;;  %v788_v41 = vadd.f32 %v787_v16, %v786_v3 }
 0x14c   :  { %v782_v19 = vadd.f32 %v781_v6, %v780_v54  ;;  %v794_v22 = vadd.f32 %v793_v10, %v792_v58  ;;  %v777_v51 = vrot.slane %v776_v32, 1 }
 0x14e   :  { %v778_v3 = vadd.f32 %v777_v51, %v776_v32 }
 0x14f   :  { %v651_v46 = vpop.f32.mrf.mxu0  ;;  %v692_v50 = vpop.f32.mrf.mxu1 }
 0x150   :  { %v652_v49 = vadd.f32 %v651_v46, %v194_v36  ;;  %v693_v52 = vadd.f32 %v692_v50, %v202_v42 }
 0x151   :  { %v653_v53 = vpop.f32.mrf.mxu0  ;;  %v694_v57 = vpop.f32.mrf.mxu1 }
 0x152   :  { %v725_v55 = vrot.slane %v652_v49, 4  ;;  %v654_v56 = vadd.f32 %v653_v53, %v198_v44  ;;  %v737_v59 = vrot.slane %v693_v52, 4  ;;  %v695_v60 = vadd.f32 %v694_v57, %v206_v47 }
 0x153   :  { %v655_v61 = vpop.f32.mrf.mxu0  ;;  %v696_v2 = vpop.f32.mrf.mxu1  ;;  %v783_v44 = vrot.slane %v782_v19, 1  ;;  %v795_v47 = vrot.slane %v794_v22, 1 }
 0x154   :  { %v726_v63 = vadd.f32 %v725_v55, %v652_v49  ;;  %v731_v1 = vrot.slane %v654_v56, 4  ;;  %v738_v38 = vadd.f32 %v737_v59, %v693_v52  ;;  %v743_v4 = vrot.slane %v695_v60, 4 }
 0x155   :  { %v656_v5 = vpop.f32.mrf.mxu0  ;;  %v697_v9 = vpop.f32.mrf.mxu1  ;;  %v789_v55 = vrot.slane %v788_v41, 1  ;;  %v784_v59 = vadd.f32 %v783_v44, %v782_v19 }
 0x156   :  { %v727_v7 = vrot.slane %v726_v63, 2  ;;  %v732_v8 = vadd.f32 %v731_v1, %v654_v56  ;;  %v739_v12 = vrot.slane %v738_v38, 2  ;;  %v744_v13 = vadd.f32 %v743_v4, %v695_v60 }
 0x157   :  { %v822_v6 = vmul.f32 0.125, %v784_v59 }
 0x158   :  { %v728_v11 = vadd.f32 %v727_v7, %v726_v63  ;;  %v733_v15 = vrot.slane %v732_v8, 2  ;;  %v740_v17 = vadd.f32 %v739_v12, %v738_v38  ;;  %v745_v18 = vrot.slane %v744_v13, 2 }
 0x159   :  { %v796_v63 = vadd.f32 %v795_v47, %v794_v22  ;;  %v821_v12 = vmul.f32 0.125, %v778_v3  ;;  %v830_v16 = vadd.f32 1e-05, %v822_v6 }
 0x15a   :  { %v729_v20 = vrot.slane %v728_v11, 1  ;;  %v734_v21 = vadd.f32 %v733_v15, %v732_v8  ;;  %v741_v23 = vrot.slane %v740_v17, 1  ;;  %v746_v30 = vadd.f32 %v745_v18, %v744_v13 }
 0x15b   :  { %v824_v8 = vmul.f32 0.125, %v796_v63  ;;  %v829_v22 = vadd.f32 1e-05, %v821_v12  ;;  %2083 = vrsqrt.f32 %v830_v16 }
 0x15c   :  { %v730_v35 = vadd.f32 %v729_v20, %v728_v11  ;;  %v735_v36 = vrot.slane %v734_v21, 1  ;;  %v742_v42 = vadd.f32 %v741_v23, %v740_v17  ;;  %v747_v43 = vrot.slane %v746_v30, 1 }
 0x15d   :  { %v832_v19 = vadd.f32 1e-05, %v824_v8 }
 0x15e   :  { %v753_v45 = vmul.f32 0.125, %v730_v35  ;;  %v736_v46 = vadd.f32 %v735_v36, %v734_v21  ;;  %v755_v48 = vmul.f32 0.125, %v742_v42  ;;  %v748_v50 = vadd.f32 %v747_v43, %v746_v30 }
 0x15f   :  { %2085 = vrsqrt.f32 %v832_v19  ;;  %v699_v19 = vld [vmem:[#allocation8] sm:$0xff] }
 0x160   :  { %v2420_v53 = vsub.f32 %v652_v49, %v753_v45  ;;  %v754_v54 = vmul.f32 0.125, %v736_v46  ;;  %v2422_v57 = vsub.f32 %v693_v52, %v755_v48  ;;  %v756_v58 = vmul.f32 0.125, %v748_v50 }
 0x161   :  { %v790_v52 = vadd.f32 %v789_v55, %v788_v41  ;;  %2087 = vrsqrt.f32 %v829_v22 }
 0x162   :  { %v769_v61 = vmul.f32 %v2420_v53, %v2420_v53  ;;  %v2426_v62 = vsub.f32 %v654_v56, %v754_v54  ;;  %v771_v1 = vmul.f32 %v2422_v57, %v2422_v57  ;;  %v2430_v2 = vsub.f32 %v695_v60, %v756_v58 }
 0x163   :  { %v823_v14 = vmul.f32 0.125, %v790_v52 }
 0x164   :  { %v797_v49 = vrot.slane %v769_v61, 4  ;;  %v770_v38 = vmul.f32 %v2426_v62, %v2426_v62  ;;  %v809_v4 = vrot.slane %v771_v1, 4  ;;  %v772_v5 = vmul.f32 %v2430_v2, %v2430_v2 }
 0x165   :  { %v831_v32 = vadd.f32 1e-05, %v823_v14 }
 0x166   :  { %v798_v7 = vadd.f32 %v797_v49, %v769_v61  ;;  %v803_v56 = vrot.slane %v770_v38, 4  ;;  %v810_v9 = vadd.f32 %v809_v4, %v771_v1  ;;  %v815_v10 = vrot.slane %v772_v5, 4 }
 0x167   :  { %2089 = vrsqrt.f32 %v831_v32  ;;  %v2280_v61 = vmov 1966171168  }
 0x168   :  { %v799_v13 = vrot.slane %v798_v7, 2  ;;  %v804_v60 = vadd.f32 %v803_v56, %v770_v38  ;;  %v811_v11 = vrot.slane %v810_v9, 2  ;;  %v816_v15 = vadd.f32 %v815_v10, %v772_v5  ;;  %v2084_v1 = vpop.eup %2083 }
 0x169   :  { %v858_v63 = vunpack.c.l.s4 %v2280_v61 }
 0x16a   :  { %v800_v17 = vadd.f32 %v799_v13, %v798_v7  ;;  %v805_v18 = vrot.slane %v804_v60, 2  ;;  %v812_v20 = vadd.f32 %v811_v11, %v810_v9  ;;  %v817_v21 = vrot.slane %v816_v15, 2 }
 0x16b   :  { %v859_v3 = vunpack.c.0.s8 %v858_v63 }
 0x16c   :  { %v801_v23 = vrot.slane %v800_v17, 1  ;;  %v806_v30 = vadd.f32 %v805_v18, %v804_v60  ;;  %v813_v35 = vrot.slane %v812_v20, 1  ;;  %v818_v36 = vadd.f32 %v817_v21, %v816_v15  ;;  %v2086_v49 = vpop.eup %2085 }
 0x16d   :  { %v862_v5 = vsub.s32 %v859_v3, %v2360_v34 }
 0x16e   :  { %v802_v41 = vadd.f32 %v801_v23, %v800_v17  ;;  %v807_v42 = vrot.slane %v806_v30, 1  ;;  %v814_v43 = vadd.f32 %v813_v35, %v812_v20  ;;  %v819_v44 = vrot.slane %v818_v36, 1  ;;  %v2088_v38 = vpop.eup %2087  ;;  %v2437_v20 = vld [vmem:[#allocation10] sm:$0xff] }
 0x16f   :  { %v853_v4 = vcombine.low %v2088_v38, %v2084_v1  ;;  %v965_v22 = vrot.slane %v2437_v20, %v2368_v39  ;;  %v961_v23 = vrot.slane %v2437_v20, %v2371_v40  ;;  %v957_v32 = vrot.slane %v2437_v20, %v2363_v37 }
 0x170   :  { %v825_v45 = vmul.f32 0.125, %v802_v41  ;;  %v808_v46 = vadd.f32 %v807_v42, %v806_v30  ;;  %v827_v47 = vmul.f32 0.125, %v814_v43  ;;  %v820_v48 = vadd.f32 %v819_v44, %v818_v36 }
 0x171   :  { %v863_v9 = vrot.slane %v853_v4, %v862_v5  ;;  %v969_v30 = vrot.slane %v2437_v20, %v2374_v0  ;;  %v981_v4 = vrot.slane %v2437_v20, %v2396_v29 }
 0x172   :  { %v833_v50 = vadd.f32 1e-05, %v825_v45  ;;  %v826_v51 = vmul.f32 0.125, %v808_v46  ;;  %v835_v54 = vadd.f32 1e-05, %v827_v47  ;;  %v828_v55 = vmul.f32 0.125, %v820_v48 }
 0x173   :  { %v977_v45 = vrot.slane %v2437_v20, %v2401_v31  ;;  %v985_v46 = vrot.slane %v2437_v20, %v2406_v33 }
 0x174   :  { %2091 = vrsqrt.f32 %v833_v50  ;;  %v834_v58 = vadd.f32 1e-05, %v826_v51  ;;  %v836_v59 = vadd.f32 1e-05, %v828_v55  ;;  %v2090_v52 = vpop.eup %2089 }
 0x175   :  { %2093 = vrsqrt.f32 %v835_v54  ;;  %v854_v6 = vcombine.low %v2090_v52, %v2086_v49  ;;  %v973_v52 = vrot.slane %v2437_v20, %v2391_v27  ;;  %v2053_v20 = vld [vmem:[#allocation11 + $0x138] sm:$0xff]  }
 0x176   :  { %2095 = vrsqrt.f32 %v834_v58 }
 0x177   :  { %2097 = vrsqrt.f32 %v836_v59  ;;  %v870_v10 = vrot.slane %v854_v6, %v862_v5 }
 0x179   :  { %v885_v11 = vcombine.low %v863_v9, %v870_v10 }
 0x17b   :  { %v893_v17 = vrot.slane %v885_v11, %v862_v5 }
 0x181   :  { %v2092_v7 = vpop.eup %2091 }
 0x182   :  { %v2094_v56 = vpop.eup %2093 }
 0x183   :  { %v2096_v8 = vpop.eup %2095 }
 0x184   :  { %v2098_v12 = vpop.eup %2097  ;;  %v855_v13 = vcombine.low %v2092_v7, %v2096_v8 }
 0x185   :  { %v856_v60 = vcombine.low %v2094_v56, %v2098_v12 }
 0x186   :  { %v877_v14 = vrot.slane %v855_v13, %v862_v5 }
 0x187   :  { %v884_v15 = vrot.slane %v856_v60, %v862_v5 }
 0x189   :  { %v886_v16 = vcombine.low %v877_v14, %v884_v15 }
 0x18b   :  { %v900_v18 = vrot.slane %v886_v16, %v862_v5 }
 0x18d   :  { %v901_v21 = vcombine.low %v893_v17, %v900_v18 }
 0x18f   :  { %v903_v34 = vmul.f32 %v901_v21, %v699_v19 }
 0x191   :  { %v936_v35 = vrot.slane %v903_v34, %v2406_v33  ;;  %v912_v36 = vrot.slane %v903_v34, %v2371_v40  ;;  %v920_v41 = vrot.slane %v903_v34, %v2374_v0  ;;  %v908_v42 = vrot.slane %v903_v34, %v2363_v37 }
 0x192   :  { %v916_v43 = vrot.slane %v903_v34, %v2368_v39  ;;  %v928_v44 = vrot.slane %v903_v34, %v2401_v31 }
 0x193   :  { %v952_v47 = vmul.f32 %v936_v35, %v2430_v2  ;;  %v946_v48 = vmul.f32 %v912_v36, %v2384_v24  ;;  %v948_v40 = vmul.f32 %v920_v41, %v2386_v25  ;;  %v945_v0 = vmul.f32 %v908_v42, %v2388_v26  ;;  %v2056_v42 = vld [vmem:[#allocation11 + $0x1f0] sm:$0xff]  }
 0x194   :  { %v947_v50 = vmul.f32 %v916_v43, %v2393_v28  ;;  %v950_v39 = vmul.f32 %v928_v44, %v2426_v62  ;;  %v924_v26 = vrot.slane %v903_v34, %v2391_v27  ;;  %v932_v62 = vrot.slane %v903_v34, %v2396_v29  ;;  %v2057_v44 = vld [vmem:[#allocation11 + $0x130] sm:$0xff]  }
 0x195   :  { %v995_v51 = vadd.f32 %v961_v23, %v946_v48  ;;  %v997_v54 = vadd.f32 %v969_v30, %v948_v40  ;;  %v994_v55 = vadd.f32 %v957_v32, %v945_v0  ;;  %v1001_v59 = vadd.f32 %v985_v46, %v952_v47  ;;  %v2054_v23 = vld [vmem:[#allocation11 + $0x1b8] sm:$0xff]   ;;  %v2059_v46 = vld [vmem:[#allocation11 + $0x168] sm:$0xff]  }
 0x196   :  { %v996_v58 = vadd.f32 %v965_v22, %v947_v50  ;;  %v999_v31 = vadd.f32 %v977_v45, %v950_v39  ;;  %v949_v10 = vmul.f32 %v924_v26, %v2420_v53  ;;  %v951_v11 = vmul.f32 %v932_v62, %v2422_v57  ;;  %v2055_v57 = vld [vmem:[#allocation11 + $0x170] sm:$0xff]   ;;  %v2060_v48 = vld [vmem:[#allocation11 + $0x1e8] sm:$0xff]   ;;  %v2063_v39 = vld [vmem:[#allocation11 + $0x160] sm:$0xff]  }
 0x197   :  { %v1011_v61 = vmul.f32 0.70710677, %v995_v51  ;;  %v1013_v33 = vmul.f32 0.70710677, %v997_v54  ;;  %v1010_v63 = vmul.f32 0.70710677, %v994_v55 }
 0x198   :  { %v1012_v2 = vmul.f32 0.70710677, %v996_v58  ;;  %v1015_v24 = vmul.f32 0.70710677, %v999_v31  ;;  %v1017_v25 = vmul.f32 0.70710677, %v1001_v59  ;;  %v2471_v30 = vadd.f32 %v973_v52, %v949_v10 }
 0x199   :  { %2099 = verf.f32 %v1011_v61  ;;  %v1003_v3 = vmul.f32 0.5, %v995_v51  ;;  %v1005_v5 = vmul.f32 0.5, %v997_v54  ;;  %v1002_v8 = vmul.f32 0.5, %v994_v55  ;;  %v2058_v45 = vld [vmem:[#allocation11 + $0x1b0] sm:$0xff]   ;;  %v2061_v0 = vld [vmem:[#allocation11 + $0x128] sm:$0xff]   ;;  %v2064_v51 = vld [vmem:[#allocation11 + $0x1e0] sm:$0xff]  }
 0x19a   :  { %2101 = verf.f32 %v1013_v33  ;;  %v1004_v60 = vmul.f32 0.5, %v996_v58  ;;  %v1007_v17 = vmul.f32 0.5, %v999_v31  ;;  %v1009_v21 = vmul.f32 0.5, %v1001_v59  ;;  %v2062_v50 = vld [vmem:[#allocation11 + $0x1a8] sm:$0xff]   ;;  %v2065_v54 = vld [vmem:[#allocation11 + $0x120] sm:$0xff]   ;;  %v2067_v58 = vld [vmem:[#allocation11 + $0x158] sm:$0xff]  }
 0x19b   :  { %2103 = verf.f32 %v1010_v63  ;;  %v2473_v36 = vadd.f32 %v981_v4, %v951_v11  ;;  %v1014_v47 = vmul.f32 0.70710677, %v2471_v30  ;;  %v2066_v55 = vld [vmem:[#allocation11 + $0x1a0] sm:$0xff]   ;;  %v2068_v31 = vld [vmem:[#allocation11 + $0x1d8] sm:$0xff]   ;;  %v2071_v33 = vld [vmem:[#allocation11 + $0x150] sm:$0xff]  }
 0x19c   :  { %2105 = verf.f32 %v1012_v2  ;;  %v2069_v59 = vld [vmem:[#allocation11 + $0x118] sm:$0xff]   ;;  %v2072_v63 = vld [vmem:[#allocation11 + $0x1d0] sm:$0xff]   ;;  %v2080_v52 = vld [vmem:[#allocation11 + $0x1c0] sm:$0xff]  }
 0x19d   :  { %2107 = verf.f32 %v1015_v24  ;;  %v1016_v40 = vmul.f32 0.70710677, %v2473_v36  ;;  %v2070_v61 = vld [vmem:[#allocation11 + $0x198] sm:$0xff]   ;;  %v2073_v2 = vld [vmem:[#allocation11 + $0x110] sm:$0xff]  }
 0x19e   :  { %2109 = verf.f32 %v1017_v25  ;;  %v2074_v24 = vld [vmem:[#allocation11 + $0x190] sm:$0xff]   ;;  %v2075_v25 = vld [vmem:[#allocation11 + $0x148] sm:$0xff]  }
 0x19f   :  { %2111 = verf.f32 %v1014_v47 }
 0x1a0   :  { %2113 = verf.f32 %v1016_v40 }
 0x1a6   :  { %v2100_v28 = vpop.eup %2099 }
 0x1a7   :  { %v2102_v1 = vpop.eup %2101  ;;  %v1027_v49 = vadd.f32 1.0, %v2100_v28  ;;  %v2076_v28 = vld [vmem:[#allocation11 + $0x1c8] sm:$0xff]  }
 0x1a8   :  { %v2104_v38 = vpop.eup %2103  ;;  %v1029_v6 = vadd.f32 1.0, %v2102_v1  ;;  %v2077_v1 = vld [vmem:[#allocation11 + $0x108] sm:$0xff]  }
 0x1a9   :  { %v2106_v7 = vpop.eup %2105  ;;  %v1035_v56 = vmul.f32 %v1027_v49, %v1003_v3  ;;  %v1026_v9 = vadd.f32 1.0, %v2104_v38  ;;  %v2078_v3 = vld [vmem:[#allocation11 + $0x188] sm:$0xff]   ;;  %v2079_v49 = vld [vmem:[#allocation11 + $0x140] sm:$0xff]  }
 0x1aa   :  { %v2108_v12 = vpop.eup %2107  ;;  %v1037_v13 = vmul.f32 %v1029_v6, %v1005_v5  ;;  %v1028_v14 = vadd.f32 1.0, %v2106_v7  ;;  %v1006_v5 = vmul.f32 0.5, %v2471_v30  ;;  %v2081_v6 = vld [vmem:[#allocation11 + $0x100] sm:$0xff]   ;;  %v1008_v7 = vmul.f32 0.5, %v2473_v36 }
 0x1ab   :  { %v2110_v15 = vpop.eup %2109  ;;  %v1043_v16 = vpack.c.bf16 %v1035_v56, %v1035_v56  ;;  %v1034_v27 = vmul.f32 %v1026_v9, %v1002_v8  ;;  %v1031_v18 = vadd.f32 1.0, %v2108_v12  ;;  %v2082_v56 = vld [vmem:[#allocation11 + $0x180] sm:$0xff]  }
 0x1ac   :  { %v1045_v29 = vpack.c.bf16 %v1037_v13, %v1037_v13  ;;  %v1036_v19 = vmul.f32 %v1028_v14, %v1004_v60  ;;  %v1033_v34 = vadd.f32 1.0, %v2110_v15  ;;  %v2112_v26 = vpop.eup %2111 }
 0x1ad   :  { %1601 = vmatprep.mubr.bf16.mxu0 %v1043_v16  ;;  %v1042_v22 = vpack.c.bf16 %v1034_v27, %v1034_v27  ;;  %v1039_v53 = vmul.f32 %v1031_v18, %v1007_v17  ;;  %v2114_v62 = vpop.eup %2113  ;;  %v1030_v38 = vadd.f32 1.0, %v2112_v26  ;;  %v1917_v26 = vld [vmem:[%s2500_s8] ss:$0 sm:$0xff] }
 0x1ae   :  { %1641 = vmatprep.mubr.bf16.mxu1 %v1045_v29  ;;  %v1044_v32 = vpack.c.bf16 %v1036_v19, %v1036_v19  ;;  %v1041_v35 = vmul.f32 %v1033_v34, %v1009_v21  ;;  %v1032_v4 = vadd.f32 1.0, %v2114_v62  ;;  %v1852_v29 = vld [vmem:[%s2498_s6] ss:$0 sm:$0xff] }
 0x1af   :  { %1602 = vmatmul.mubr.bf16.vlgmr.msra.gmra.mxu0 %v1042_v22  ;;  %v1047_v41 = vpack.c.bf16 %v1039_v53, %v1039_v53  ;;  %v1038_v8 = vmul.f32 %v1030_v38, %v1006_v5 }
 0x1b0   :  { %1642 = vmatmul.mubr.bf16.vlgmr.msra.gmra.mxu1 %v1044_v32  ;;  %1963 = vmatpush3.bf16.msra.mxu0 %v2053_v20  ;;  %v1049_v43 = vpack.c.bf16 %v1041_v35, %v1041_v35  ;;  %v1040_v9 = vmul.f32 %v1032_v4, %v1008_v7 }
 0x1b1   :  { %1985 = vmatpush3.bf16.msra.mxu1 %v2054_v23  ;;  %1681 = vmatprep.mubr.bf16.mxu0 %v1047_v41  ;;  %v1046_v10 = vpack.c.bf16 %v1038_v8, %v1038_v8 }
 0x1b2   :  { %1721 = vmatprep.mubr.bf16.mxu1 %v1049_v43  ;;  %1964 = vmatprep.subr.bf16.mxu0 %v2055_v57  ;;  %v1048_v12 = vpack.c.bf16 %v1040_v9, %v1040_v9 }
 0x1b3   :  { %1986 = vmatprep.subr.bf16.mxu1 %v2056_v42 }
 0x1b4   :  { %1965 = vmatpush3.bf16.msra.mxu0 %v2057_v44 }
 0x1b5   :  { %1987 = vmatpush3.bf16.msra.mxu1 %v2058_v45  ;;  %1966 = vmatprep.subr.bf16.mxu0 %v2059_v46 }
 0x1b6   :  { %1988 = vmatprep.subr.bf16.mxu1 %v2060_v48 }
 0x1b8   :  { %1967 = vmatpush3.bf16.msra.mxu0 %v2061_v0 }
 0x1b9   :  { %1989 = vmatpush3.bf16.msra.mxu1 %v2062_v50  ;;  %1968 = vmatprep.subr.bf16.mxu0 %v2063_v39 }
 0x1ba   :  { %1990 = vmatprep.subr.bf16.mxu1 %v2064_v51 }
 0x1bc   :  { %1969 = vmatpush3.bf16.msra.mxu0 %v2065_v54 }
 0x1bd   :  { %1991 = vmatpush3.bf16.msra.mxu1 %v2066_v55  ;;  %1970 = vmatprep.subr.bf16.mxu0 %v2067_v58 }
 0x1be   :  { %1992 = vmatprep.subr.bf16.mxu1 %v2068_v31 }
 0x1c0   :  { %1971 = vmatpush3.bf16.msra.mxu0 %v2069_v59 }
 0x1c1   :  { %1993 = vmatpush3.bf16.msra.mxu1 %v2070_v61  ;;  %1972 = vmatprep.subr.bf16.mxu0 %v2071_v33 }
 0x1c2   :  { %1994 = vmatprep.subr.bf16.mxu1 %v2072_v63  ;;  %v1729_v63 = vld [vmem:[%s2499_s7] sm:$0x1]  ;;  %s2239_s7 = scalar_lea.vmem %s1777_s22, 128 }
 0x1c3   :  { %p2240_p2 = scmp.ne.s32.totalorder %s1777_s22, %s2239_s7  ;;  %p2245_p4 = scmp.lt.s32.totalorder %s2239_s7, %s2239_s7 }
 0x1c4   :  { %1973 = vmatpush3.bf16.msra.mxu0 %v2073_v2 }
 0x1c5   :  { %1995 = vmatpush3.bf16.msra.mxu1 %v2074_v24  ;;  %1974 = vmatprep.subr.bf16.mxu0 %v2075_v25  ;;  %p2246_p5 = por %p2245_p4, %p2244_p3 }
 0x1c6   :  { %1996 = vmatprep.subr.bf16.mxu1 %v2076_v28 }
 0x1c7   :  { %p2247_p6 = pnand %p2246_p5, %p2240_p2 }
 0x1c8   :  { %1975 = vmatpush3.bf16.msra.mxu0 %v2077_v1 }
 0x1c9   :  { %1997 = vmatpush3.bf16.msra.mxu1 %v2078_v3  ;;  %1976 = vmatprep.subr.bf16.mxu0 %v2079_v49 }
 0x1ca   :  { %1998 = vmatprep.subr.bf16.mxu1 %v2080_v52 }
 0x1cc   :  { %1977 = vmatpush3.bf16.msra.mxu0 %v2081_v6 }
 0x1cd   :  { %1999 = vmatpush3.bf16.msra.mxu1 %v2082_v56 }
 0x1cf   :  { %1682 = vmatmul.mubr.bf16.vlgmr.msra.gmra.mxu0 %v1046_v10 }
 0x1d0   :  { %1722 = vmatmul.mubr.bf16.vlgmr.msra.gmra.mxu1 %v1048_v12 }
 0x26f   :  { %v1934_v13 = vpop.f32.mrf.mxu0 }
 0x270   :  { %v1956_v60 = vpop.f32.mrf.mxu1 }
 0x271   :  { %v1935_v14 = vpop.f32.mrf.mxu0 }
 0x272   :  { %v1957_v11 = vpop.f32.mrf.mxu1  ;;  %v1936_v18 = vadd.f32 %v1935_v14, %v1934_v13 }
 0x273   :  { %v1937_v15 = vpop.f32.mrf.mxu0  ;;  %v1958_v21 = vadd.f32 %v1957_v11, %v1956_v60 }
 0x274   :  { %v1959_v16 = vpop.f32.mrf.mxu1  ;;  %v1604_v19 = vadd.f32 %v1936_v18, %v1852_v29 }
 0x275   :  { %v1938_v27 = vpop.f32.mrf.mxu0 }
 0x276   :  { %v1960_v17 = vpop.f32.mrf.mxu1  ;;  %v1644_v23 = vadd.f32 %v1958_v21, %v1604_v19 }
 0x28f   :  { %v1978_v20 = vpop.f32.mrf.mxu0 }
 0x290   :  { %v2000_v34 = vpop.f32.mrf.mxu1 }
 0x291   :  { %v1979_v22 = vpop.f32.mrf.mxu0 }
 0x292   :  { %v1980_v53 = vadd.f32 %v1979_v22, %v1978_v20  ;;  %v2001_v30 = vpop.f32.mrf.mxu1 }
 0x293   :  { %v1981_v32 = vpop.f32.mrf.mxu0  ;;  %v2002_v57 = vadd.f32 %v2001_v30, %v2000_v34 }
 0x294   :  { %v1684_v35 = vadd.f32 %v1980_v53, %v1644_v23  ;;  %v2003_v36 = vpop.f32.mrf.mxu1 }
 0x295   :  { %v1982_v41 = vpop.f32.mrf.mxu0 }
 0x296   :  { %v1724_v42 = vadd.f32 %v2002_v57, %v1684_v35  ;;  %v2004_v43 = vpop.f32.mrf.mxu1 }
 0x298   :  { %v1731_v44 = vrot.slane %v1724_v42, 4 }
 0x29a   :  { %v1732_v45 = vadd.f32 %v1731_v44, %v1724_v42 }
 0x29c   :  { %v1733_v46 = vrot.slane %v1732_v45, 2 }
 0x29e   :  { %v1734_v47 = vadd.f32 %v1733_v46, %v1732_v45 }
 0x2a0   :  { %v1735_v48 = vrot.slane %v1734_v47, 1 }
 0x2a2   :  { %v1736_v40 = vadd.f32 %v1735_v48, %v1734_v47 }
 0x2a4   :  { %v1737_v0 = vmul.f32 0.125, %v1736_v40 }
 0x2a6   :  { %v1738_v50 = vsub.f32 %v1724_v42, %v1737_v0 }
 0x2a8   :  { %v1739_v39 = vmul.f32 %v1738_v50, %v1738_v50 }
 0x2aa   :  { %v1740_v51 = vrot.slane %v1739_v39, 4 }
 0x2ac   :  { %v1741_v54 = vadd.f32 %v1740_v51, %v1739_v39 }
 0x2ae   :  { %v1742_v55 = vrot.slane %v1741_v54, 2 }
 0x2b0   :  { %v1743_v58 = vadd.f32 %v1742_v55, %v1741_v54 }
 0x2b2   :  { %v1744_v31 = vrot.slane %v1743_v58, 1 }
 0x2b4   :  { %v1745_v59 = vadd.f32 %v1744_v31, %v1743_v58 }
 0x2b6   :  { %v1746_v61 = vmul.f32 0.125, %v1745_v59 }
 0x2b8   :  { %v1747_v33 = vadd.f32 1e-05, %v1746_v61 }
 0x2ba   :  { %2115 = vrsqrt.f32 %v1747_v33 }
 0x2c7   :  { %v2116_v2 = vpop.eup %2115 }
 0x2c8   :  { %v1749_v24 = vmul.f32 %v2116_v2, %v1729_v63 }
 0x2ca   :  { %v1754_v25 = vrot.slane %v1749_v24, %v2363_v37 }
 0x2cc   :  { %v1756_v28 = vmul.f32 %v1754_v25, %v1738_v50 }
 0x2ce   :  { %v1763_v62 = vadd.f32 %v1917_v26, %v1756_v28 }
 0x2d0   :  { %v1765_v1 = vmul.f32 0.70710677, %v1763_v62  ;;  %v1764_v49 = vmul.f32 0.5, %v1763_v62 }
 0x2d2   :  { %2117 = verf.f32 %v1765_v1 }
 0x2df   :  { %v2118_v3 = vpop.eup %2117 }
 0x2e0   :  { %v1767_v38 = vadd.f32 1.0, %v2118_v3 }
 0x2e2   :  { %v1768_v52 = vmul.f32 %v1767_v38, %v1764_v49 }
 0x2e4   :  { %1769 = vst [vmem:[#allocation13] sm:$0xff] %v1768_v52 }
 0x2e5   :  { %2250 = shalt.err (!%p2247_p6)
}
 0x2e6   :  { %1779 = dma.vmem_to_hbm [thread:$0]  %s1777_s22, 128, %s2501_s9, [#allocation4]  }
 0x2e7   :  { %2267 = dma.done.wait [#allocation4], 128  }
 0x2e8   :  { %2268 = vsyncadd [#allocation4], 4294967168 }
 0x2e9   :  { %1783 = vsyncpa [#allocation3], 1 }
 0x2ea   :  { %1784 = vsyncpa [#allocation6], 1 }
 0x2eb   :  { %1785 = vsyncpa [#allocation9], 1 }
 0x2ec   :  { %1786 = vsyncpa [#allocation12], 1 }
 0x2ed   :  { %1787 = vsyncpa [#allocation4], 1 }

</bundles_post_ra>
